<compile_context>
chip_gen: v7x
topology: tpu7x:2x2x1
jax: 0.10.0
libtpu: 0.0.40
codegen_flags: <defaults>
</compile_context>

<pallas_src>
import functools

import jax
import jax.numpy as jnp
from jax.experimental import pallas as pl
from jax.experimental.pallas import tpu as pltpu


# ----------------------------------------------------------------------------
# helpers
# ----------------------------------------------------------------------------
def _round_up(x, m):
    return (x + m - 1) // m * m


def _pad2(x, rows, cols):
    r, c = x.shape
    return jnp.pad(x, ((0, rows - r), (0, cols - c)))


def _pick_tile(n_pad, cap):
    """Largest multiple of 128 that divides n_pad and is <= cap."""
    best = 128
    t = 128
    while t <= min(cap, n_pad):
        if n_pad % t == 0:
            best = t
        t += 128
    return best


def _choose_tiles(n, tm_target, tk_target):
    """Pick (tm, tk, n_pad): big row tiles, bounded padding, >=2 row tiles
    (for v7x's two TensorCores) when that costs no extra padding."""
    n128 = _round_up(max(n, 1), 128)
    tm_cap = max(128, min(_round_up(tm_target, 128), n128))
    tm = _pick_tile(n128, tm_cap)
    n_pad = n128
    # Awkward N whose only 128-multiple divisors are tiny: pad N up to a
    # multiple of a larger row tile, capped at ~25% extra A traffic (A ~ n^2).
    if tm < min(256, tm_cap):
        cand = tm_cap
        while cand > tm:
            npad_c = _round_up(n128, cand)
            if npad_c * npad_c <= int(1.25 * n128 * n128):
                tm, n_pad = cand, npad_c
                break
            cand -= 128
    # Prefer >= 2 row tiles when the graph is big enough and the tile stays
    # reasonably large (row axis is 'parallel' -> can split across 2 TCs).
    if n_pad // tm < 2 and n_pad >= 512:
        half = _pick_tile(n_pad, n_pad // 2)
        if half >= 256:
            tm = half
    tk = _pick_tile(n_pad, max(tk_target, tm))
    return tm, tk, n_pad


def _vmem_cap(est_bytes):
    """Explicit scoped-VMEM limit: above v5e's 16 MiB default, <= 64 MiB so it
    is always valid on v7x."""
    limit = max(int(1.25 * est_bytes) + (4 << 20), 32 << 20)
    return int(min(limit, 64 << 20))


# ----------------------------------------------------------------------------
# Pallas kernel: pre-projection  Xp = X @ W_neigh   (layer-2 reassociation)
# ----------------------------------------------------------------------------
def _project_kernel(x_ref, w_ref, o_ref):
    o_ref[...] = jnp.dot(x_ref[...], w_ref[...],
                         preferred_element_type=jnp.float32).astype(o_ref.dtype)


def _project(x, w, *, tm):
    n_pad, fin_p = x.shape
    out_p = w.shape[1]
    est = 2 * (tm * fin_p * 2 + fin_p * out_p * 2 + tm * out_p * 2)
    return pl.pallas_call(
        _project_kernel,
        out_shape=jax.ShapeDtypeStruct((n_pad, out_p), jnp.bfloat16),
        grid_spec=pltpu.PrefetchScalarGridSpec(
            num_scalar_prefetch=0,
            grid=(n_pad // tm,),
            in_specs=[pl.BlockSpec((tm, fin_p), lambda i: (i, 0)),
                      pl.BlockSpec((fin_p, out_p), lambda i: (0, 0))],
            out_specs=pl.BlockSpec((tm, out_p), lambda i: (i, 0))),
        compiler_params=pltpu.CompilerParams(
            dimension_semantics=("parallel",),
            vmem_limit_bytes=_vmem_cap(est)),
    )(x, w)


# ----------------------------------------------------------------------------
# Pallas kernel: one SAGEConv('mean') layer, optionally fused with ReLU.
# Grid = (row tiles of destination nodes, K tiles of source nodes).
# ----------------------------------------------------------------------------
def _sage_layer_kernel(*refs, relu, pre_projected, xs_resident, tk):
    if pre_projected:
        (a_ref, xs_ref, xd_ref, invd_ref, w_self_ref, b_ref,
         o_ref, acc_ref) = refs
        w_neigh_ref = None
    else:
        (a_ref, xs_ref, xd_ref, invd_ref, w_self_ref, w_neigh_ref, b_ref,
         o_ref, acc_ref) = refs

    k = pl.program_id(1)

    if xs_resident:
        # X (or the pre-projected Xp) lives fully in VMEM; slice the current
        # K tile out of the resident block.
        start = pl.multiple_of(k * tk, 128)
        xs = xs_ref[pl.ds(start, tk), :]
    else:
        xs = xs_ref[...]

    # Partial neighbor-sum over this K tile of source nodes (A is binary,
    # exact in bf16; the 1/deg normalization is applied in f32 afterwards).
    part = jnp.dot(a_ref[...], xs, preferred_element_type=jnp.float32)

    @pl.when(k == 0)
    def _():
        acc_ref[...] = part          # assign on first step: no zero-fill RMW

    @pl.when(k != 0)
    def _():
        acc_ref[...] += part

    @pl.when(k == pl.num_programs(1) - 1)
    def _():
        neigh = acc_ref[...] * invd_ref[...]              # f32 mean (exact 1/deg)
        h = jnp.dot(xd_ref[...], w_self_ref[...],
                    preferred_element_type=jnp.float32)   # self projection
        if pre_projected:
            h = h + neigh                                 # neighbor path already @W_neigh
        else:
            h = h + jnp.dot(neigh.astype(jnp.bfloat16), w_neigh_ref[...],
                            preferred_element_type=jnp.float32)
        h = h + b_ref[...]
        if relu:
            h = jnp.maximum(h, 0.0)
        o_ref[...] = h.astype(o_ref.dtype)


def _sage_layer_call(a_pad, xs, xd, inv_deg, w_self, w_neigh, bias, *,
                     relu, pre_projected, out_dtype, tm, tk, xs_resident):
    n_pad = a_pad.shape[0]
    xs_w = xs.shape[1]          # streamed width (fin_p, or out_p if pre-projected)
    fin_p = xd.shape[1]
    out_p = w_self.shape[1]
    grid = (n_pad // tm, n_pad // tk)

    if xs_resident:
        xs_spec = pl.BlockSpec((n_pad, xs_w), lambda i, k: (0, 0))
    else:
        xs_spec = pl.BlockSpec((tk, xs_w), lambda i, k: (k, 0))

    in_specs = [
        pl.BlockSpec((tm, tk), lambda i, k: (i, k)),        # A tile (streams)
        xs_spec,                                            # source feats
        pl.BlockSpec((tm, fin_p), lambda i, k: (i, 0)),     # x_dst (per row tile)
        pl.BlockSpec((tm, 1), lambda i, k: (i, 0)),         # 1/in_deg (f32)
        pl.BlockSpec((fin_p, out_p), lambda i, k: (0, 0)),  # W_self (resident)
    ]
    args = [a_pad, xs, xd, inv_deg, w_self]
    if not pre_projected:
        in_specs.append(pl.BlockSpec((xs_w, out_p), lambda i, k: (0, 0)))  # W_neigh
        args.append(w_neigh)
    in_specs.append(pl.BlockSpec((1, out_p), lambda i, k: (0, 0)))         # bias
    args.append(bias)

    out_bytes = 2 if out_dtype == jnp.bfloat16 else 4
    est = (2 * tm * tk * 2
           + 2 * (n_pad if xs_resident else tk) * xs_w * 2
           + 2 * tm * fin_p * 2
           + 2 * tm * 128 * 4
           + 2 * fin_p * out_p * 2 + 2 * xs_w * out_p * 2
           + 2 * 8 * out_p * 4
           + 2 * tm * out_p * out_bytes
           + tm * xs_w * 4)

    kernel = functools.partial(_sage_layer_kernel, relu=relu,
                               pre_projected=pre_projected,
                               xs_resident=xs_resident, tk=tk)
    return pl.pallas_call(
        kernel,
        out_shape=jax.ShapeDtypeStruct((n_pad, out_p), out_dtype),
        grid_spec=pltpu.PrefetchScalarGridSpec(
            num_scalar_prefetch=0,
            grid=grid,
            in_specs=in_specs,
            out_specs=pl.BlockSpec((tm, out_p), lambda i, k: (i, 0)),
            scratch_shapes=[pltpu.VMEM((tm, xs_w), jnp.float32)],
        ),
        compiler_params=pltpu.CompilerParams(
            dimension_semantics=("parallel", "arbitrary"),
            vmem_limit_bytes=_vmem_cap(est)),
    )(*args)


def _run_layer(a_pad, x_pad, inv_deg, w_self, w_neigh, bias, *, relu,
               out_dtype, tm, tk, xs_resident_max_bytes):
    n_pad = a_pad.shape[0]
    fin_p = x_pad.shape[1]
    out_p = w_self.shape[1]
    # Reassociate A @ (X @ W_neigh) when the output width is narrower than the
    # input width: narrower streamed operand, smaller accumulator, fewer
    # K-loop MXU FLOPs.
    pre_projected = out_p < fin_p
    if pre_projected:
        xs = _project(x_pad, w_neigh, tm=tm)          # [n_pad, out_p] bf16
    else:
        xs = x_pad
    xs_resident = (n_pad * xs.shape[1] * 2) <= xs_resident_max_bytes
    return _sage_layer_call(a_pad, xs, x_pad, inv_deg, w_self,
                            None if pre_projected else w_neigh, bias,
                            relu=relu, pre_projected=pre_projected,
                            out_dtype=out_dtype, tm=tm, tk=tk,
                            xs_resident=xs_resident)


def sage_forward(adj, x, params, *, tm=512, tk=1024,
                 xs_resident_max_bytes=4 << 20):
    """Two-layer SAGE: relu(conv1) -> conv2.

    adj    : [N, N] dense binary adjacency (adj[i, j] = 1 for edge j -> i)
    x      : [N, in_feats] f32 node features
    params : dict of w_self1/w_neigh1/b1/w_self2/w_neigh2/b2
    """
    n = x.shape[0]
    in_feats = x.shape[1]
    out_feats = params["w_self2"].shape[1]

    tm_, tk_, n_pad = _choose_tiles(n, tm, tk)
    fin_p = _round_up(in_feats, 128)
    h_p = _round_up(params["w_self1"].shape[1], 128)
    out_p = _round_up(out_feats, 128)

    # Binary adjacency is exact in bf16; 1/in_deg stays f32 (applied in-kernel).
    adj32 = adj.astype(jnp.float32)
    a_pad = _pad2(adj32, n_pad, n_pad).astype(jnp.bfloat16)
    in_deg = adj32.sum(axis=1)
    inv_deg = jnp.where(in_deg > 0, 1.0 / jnp.maximum(in_deg, 1.0), 0.0)
    inv_deg = jnp.pad(inv_deg, (0, n_pad - n)).reshape(n_pad, 1).astype(jnp.float32)

    x_pad = _pad2(x, n_pad, fin_p).astype(jnp.bfloat16)
    ws1 = _pad2(params["w_self1"], fin_p, h_p).astype(jnp.bfloat16)
    wn1 = _pad2(params["w_neigh1"], fin_p, h_p).astype(jnp.bfloat16)
    b1 = _pad2(params["b1"], 1, h_p).astype(jnp.float32)
    ws2 = _pad2(params["w_self2"], h_p, out_p).astype(jnp.bfloat16)
    wn2 = _pad2(params["w_neigh2"], h_p, out_p).astype(jnp.bfloat16)
    b2 = _pad2(params["b2"], 1, out_p).astype(jnp.float32)

    # Layer 1: ReLU fused, output emitted as bf16 directly from the kernel.
    h = _run_layer(a_pad, x_pad, inv_deg, ws1, wn1, b1, relu=True,
                   out_dtype=jnp.bfloat16, tm=tm_, tk=tk_,
                   xs_resident_max_bytes=xs_resident_max_bytes)
    # Layer 2: final f32 output.
    out = _run_layer(a_pad, h, inv_deg, ws2, wn2, b2, relu=False,
                     out_dtype=jnp.float32, tm=tm_, tk=tk_,
                     xs_resident_max_bytes=xs_resident_max_bytes)
    return out[:n, :out_feats]


# ----------------------------------------------------------------------------
# Pure-JAX reference with the same bf16 quantization points (tight check).
# ----------------------------------------------------------------------------
def sage_forward_ref(adj, x, params):
    a = adj.astype(jnp.float32)
    in_deg = a.sum(axis=1, keepdims=True)
    inv_deg = jnp.where(in_deg > 0, 1.0 / jnp.maximum(in_deg, 1.0), 0.0)

    def bf(v):
        return v.astype(jnp.bfloat16).astype(jnp.float32)

    def layer(x32, ws, wn, b, relu):
        xb = bf(x32)
        fin_p = _round_up(x32.shape[1], 128)
        out_p = _round_up(ws.shape[1], 128)
        if out_p < fin_p:                        # mirrors kernel reassociation
            xp = bf(xb @ bf(wn))
            h = xb @ bf(ws) + (a @ xp) * inv_deg + b
        else:
            neigh = bf((a @ xb) * inv_deg)
            h = xb @ bf(ws) + neigh @ bf(wn) + b
        return jnp.maximum(h, 0.0) if relu else h

    h = layer(x, params["w_self1"], params["w_neigh1"], params["b1"], True)
    return layer(h, params["w_self2"], params["w_neigh2"], params["b2"], False)


# ----------------------------------------------------------------------------
# Self-test
# ----------------------------------------------------------------------------
if __name__ == "__main__":
    def make_inputs(seed, n, in_feats, h_feats, out_feats):
        key = jax.random.PRNGKey(seed)
        k_adj, k_x, k1, k2, k3, k4, k5, k6 = jax.random.split(key, 8)
        adj = (jax.random.uniform(k_adj, (n, n)) < 0.3).astype(jnp.float32)
        adj = adj * (1.0 - jnp.eye(n, dtype=jnp.float32))   # no self loops
        x = jax.random.normal(k_x, (n, in_feats), dtype=jnp.float32)
        params = {
            "w_self1": 0.1 * jax.random.normal(k1, (in_feats, h_feats), jnp.float32),
            "w_neigh1": 0.1 * jax.random.normal(k2, (in_feats, h_feats), jnp.float32),
            "b1": 0.1 * jax.random.normal(k5, (1, h_feats), jnp.float32),
            "w_self2": 0.1 * jax.random.normal(k3, (h_feats, out_feats), jnp.float32),
            "w_neigh2": 0.1 * jax.random.normal(k4, (h_feats, out_feats), jnp.float32),
            "b2": 0.1 * jax.random.normal(k6, (1, out_feats), jnp.float32),
        }
        return adj, x, params

    def check(out, ref, tag):
        err = float(jnp.max(jnp.abs(out - ref)))
        assert jnp.allclose(out, ref, atol=2e-2, rtol=2e-2), f"{tag}: max_err={err}"

    # 1) Main config (N=16, in=8, hidden=32, out=4): VMEM-resident X path.
    adj, x, params = make_inputs(0, 16, 8, 32, 4)
    ref = jax.block_until_ready(sage_forward_ref(adj, x, params))
    out = jax.block_until_ready(sage_forward(adj, x, params))
    assert out.shape == (16, 4), out.shape
    check(out, ref, "resident")

    # 2) Same config with the streamed-X path forced (resident threshold 0).
    out2 = jax.block_until_ready(
        sage_forward(adj, x, params, xs_resident_max_bytes=0))
    check(out2, ref, "streamed")

    # 3) Wider hidden (256) so layer 2 takes the reassociated A @ (X @ W) path.
    adj3, x3, params3 = make_inputs(0, 16, 8, 256, 4)
    ref3 = jax.block_until_ready(sage_forward_ref(adj3, x3, params3))
    out3 = jax.block_until_ready(sage_forward(adj3, x3, params3))
    assert out3.shape == (16, 4), out3.shape
    check(out3, ref3, "reassociated")

    print("KERNEL_OK")
</pallas_src>

<mosaic_0001>
module attributes {stable_mosaic.version = 11 : i64} {
  func.func @_sage_layer_kernel(%arg0: i32, %arg1: i32, %arg2: memref<128x128xbf16, #tpu.memory_space<vmem>>, %arg3: memref<128x128xbf16, #tpu.memory_space<vmem>>, %arg4: memref<128x128xbf16, #tpu.memory_space<vmem>>, %arg5: memref<128x1xf32, #tpu.memory_space<vmem>>, %arg6: memref<128x128xbf16, #tpu.memory_space<vmem>>, %arg7: memref<128x128xbf16, #tpu.memory_space<vmem>>, %arg8: memref<1x128xf32, #tpu.memory_space<vmem>>, %arg9: memref<128x128xbf16, #tpu.memory_space<vmem>>, %arg10: memref<128x128xf32, #tpu.memory_space<vmem>>) attributes {dimension_semantics = [#tpu.dimension_semantics<parallel>, #tpu.dimension_semantics<arbitrary>], iteration_bounds = array<i64: 1, 1>, scalar_prefetch = 0 : i64, scratch_operands = 1 : i64, tpu.core_type = #tpu.core_type<tc>, window_params = [{transform_indices = @transform_0, window_bounds = array<i64: 128, 128>}, {pipeline_mode = #tpu.pipeline_mode<synchronous>, transform_indices = @transform_1, window_bounds = array<i64: 128, 128>}, {transform_indices = @transform_2, window_bounds = array<i64: 128, 128>}, {transform_indices = @transform_3, window_bounds = array<i64: 128, 1>}, {pipeline_mode = #tpu.pipeline_mode<synchronous>, transform_indices = @transform_4, window_bounds = array<i64: 128, 128>}, {pipeline_mode = #tpu.pipeline_mode<synchronous>, transform_indices = @transform_5, window_bounds = array<i64: 128, 128>}, {pipeline_mode = #tpu.pipeline_mode<synchronous>, transform_indices = @transform_6, window_bounds = array<i64: 1, 128>}, {transform_indices = @transform_7, window_bounds = array<i64: 128, 128>}]} {
    %c128_i32 = arith.constant 128 : i32
    %0 = arith.muli %arg1, %c128_i32 : i32
    %1 = tpu.assume_multiple %0, 128 : i32
    %2 = arith.index_cast %1 : i32 to index
    %c0 = arith.constant 0 : index
    %3 = vector.load %arg3[%2, %c0] : memref<128x128xbf16, #tpu.memory_space<vmem>>, vector<128x128xbf16>
    %c0_0 = arith.constant 0 : index
    %c0_1 = arith.constant 0 : index
    %4 = vector.load %arg2[%c0_0, %c0_1] : memref<128x128xbf16, #tpu.memory_space<vmem>>, vector<128x128xbf16>
    %cst = arith.constant dense<0.000000e+00> : vector<128x128xf32>
    %5 = tpu.matmul %4, %3, %cst {dimension_numbers = #tpu.dot_dimension_numbers<[1], [0], [0], [1], [0, 0, 1, 1], [], []>} : vector<128x128xbf16>, vector<128x128xbf16>, vector<128x128xf32> -> vector<128x128xf32>
    %c0_i32 = arith.constant 0 : i32
    %6 = arith.cmpi eq, %arg1, %c0_i32 : i32
    %7 = arith.extui %6 : i1 to i32
    %c0_i32_2 = arith.constant 0 : i32
    %8 = arith.cmpi ne, %7, %c0_i32_2 : i32
    scf.if %8 {
      %c0_7 = arith.constant 0 : index
      %c0_8 = arith.constant 0 : index
      %15 = vector.load %arg10[%c0_7, %c0_8] : memref<128x128xf32, #tpu.memory_space<vmem>>, vector<128x128xf32>
      tpu.vector_store %arg10[%c0_7, %c0_8], %5 {strides = array<i32>} : memref<128x128xf32, #tpu.memory_space<vmem>>, vector<128x128xf32>,
    } else {
    }
    %c0_i32_3 = arith.constant 0 : i32
    %9 = arith.cmpi ne, %arg1, %c0_i32_3 : i32
    %10 = arith.extui %9 : i1 to i32
    %c0_i32_4 = arith.constant 0 : i32
    %11 = arith.cmpi ne, %10, %c0_i32_4 : i32
    scf.if %11 {
      %c0_7 = arith.constant 0 : index
      %c0_8 = arith.constant 0 : index
      %15 = vector.load %arg10[%c0_7, %c0_8] : memref<128x128xf32, #tpu.memory_space<vmem>>, vector<128x128xf32>
      %16 = arith.addf %15, %5 : vector<128x128xf32>
      %c0_9 = arith.constant 0 : index
      %c0_10 = arith.constant 0 : index
      %17 = vector.load %arg10[%c0_9, %c0_10] : memref<128x128xf32, #tpu.memory_space<vmem>>, vector<128x128xf32>
      tpu.vector_store %arg10[%c0_9, %c0_10], %16 {strides = array<i32>} : memref<128x128xf32, #tpu.memory_space<vmem>>, vector<128x128xf32>,
    } else {
    }
    %c0_i32_5 = arith.constant 0 : i32
    %12 = arith.cmpi eq, %arg1, %c0_i32_5 : i32
    %13 = arith.extui %12 : i1 to i32
    %c0_i32_6 = arith.constant 0 : i32
    %14 = arith.cmpi ne, %13, %c0_i32_6 : i32
    scf.if %14 {
      %c0_7 = arith.constant 0 : index
      %c0_8 = arith.constant 0 : index
      %15 = vector.load %arg10[%c0_7, %c0_8] : memref<128x128xf32, #tpu.memory_space<vmem>>, vector<128x128xf32>
      %c0_9 = arith.constant 0 : index
      %c0_10 = arith.constant 0 : index
      %16 = vector.load %arg5[%c0_9, %c0_10] : memref<128x1xf32, #tpu.memory_space<vmem>>, vector<128x1xf32>
      %17 = vector.broadcast %16 : vector<128x1xf32> to vector<128x128xf32>
      %18 = arith.mulf %15, %17 : vector<128x128xf32>
      %c0_11 = arith.constant 0 : index
      %c0_12 = arith.constant 0 : index
      %19 = vector.load %arg4[%c0_11, %c0_12] : memref<128x128xbf16, #tpu.memory_space<vmem>>, vector<128x128xbf16>
      %c0_13 = arith.constant 0 : index
      %c0_14 = arith.constant 0 : index
      %20 = vector.load %arg6[%c0_13, %c0_14] : memref<128x128xbf16, #tpu.memory_space<vmem>>, vector<128x128xbf16>
      %cst_15 = arith.constant dense<0.000000e+00> : vector<128x128xf32>
      %21 = tpu.matmul %19, %20, %cst_15 {dimension_numbers = #tpu.dot_dimension_numbers<[1], [0], [0], [1], [0, 0, 1, 1], [], []>} : vector<128x128xbf16>, vector<128x128xbf16>, vector<128x128xf32> -> vector<128x128xf32>
      %22 = arith.truncf %18 : vector<128x128xf32> to vector<128x128xbf16>
      %c0_16 = arith.constant 0 : index
      %c0_17 = arith.constant 0 : index
      %23 = vector.load %arg7[%c0_16, %c0_17] : memref<128x128xbf16, #tpu.memory_space<vmem>>, vector<128x128xbf16>
      %cst_18 = arith.constant dense<0.000000e+00> : vector<128x128xf32>
      %24 = tpu.matmul %22, %23, %cst_18 {dimension_numbers = #tpu.dot_dimension_numbers<[1], [0], [0], [1], [0, 0, 1, 1], [], []>} : vector<128x128xbf16>, vector<128x128xbf16>, vector<128x128xf32> -> vector<128x128xf32>
      %25 = arith.addf %21, %24 : vector<128x128xf32>
      %c0_19 = arith.constant 0 : index
      %c0_20 = arith.constant 0 : index
      %26 = vector.load %arg8[%c0_19, %c0_20] : memref<1x128xf32, #tpu.memory_space<vmem>>, vector<1x128xf32>
      %27 = vector.broadcast %26 : vector<1x128xf32> to vector<128x128xf32>
      %28 = arith.addf %25, %27 : vector<128x128xf32>
      %cst_21 = arith.constant 0.000000e+00 : f32
      %29 = vector.broadcast %cst_21 : f32 to vector<128x128xf32>
      %30 = arith.maximumf %28, %29 : vector<128x128xf32>
      %31 = arith.truncf %30 : vector<128x128xf32> to vector<128x128xbf16>
      %c0_22 = arith.constant 0 : index
      %c0_23 = arith.constant 0 : index
      %32 = vector.load %arg9[%c0_22, %c0_23] : memref<128x128xbf16, #tpu.memory_space<vmem>>, vector<128x128xbf16>
      tpu.vector_store %arg9[%c0_22, %c0_23], %31 {strides = array<i32>} : memref<128x128xbf16, #tpu.memory_space<vmem>>, vector<128x128xbf16>,
    } else {
    }
    return
  }
  func.func @transform_0(%arg0: i32, %arg1: i32) -> (i32, i32) {
    %c0_i32 = arith.constant 0 : i32
    return %arg0, %arg1 : i32, i32
  }
  func.func @transform_1(%arg0: i32, %arg1: i32) -> (i32, i32) {
    %c0_i32 = arith.constant 0 : i32
    %c0_i32_0 = arith.constant 0 : i32
    %c0_i32_1 = arith.constant 0 : i32
    return %c0_i32, %c0_i32_0 : i32, i32
  }
  func.func @transform_2(%arg0: i32, %arg1: i32) -> (i32, i32) {
    %c0_i32 = arith.constant 0 : i32
    %c0_i32_0 = arith.constant 0 : i32
    return %arg0, %c0_i32 : i32, i32
  }
  func.func @transform_3(%arg0: i32, %arg1: i32) -> (i32, i32) {
    %c0_i32 = arith.constant 0 : i32
    %c0_i32_0 = arith.constant 0 : i32
    return %arg0, %c0_i32 : i32, i32
  }
  func.func @transform_4(%arg0: i32, %arg1: i32) -> (i32, i32) {
    %c0_i32 = arith.constant 0 : i32
    %c0_i32_0 = arith.constant 0 : i32
    %c0_i32_1 = arith.constant 0 : i32
    return %c0_i32, %c0_i32_0 : i32, i32
  }
  func.func @transform_5(%arg0: i32, %arg1: i32) -> (i32, i32) {
    %c0_i32 = arith.constant 0 : i32
    %c0_i32_0 = arith.constant 0 : i32
    %c0_i32_1 = arith.constant 0 : i32
    return %c0_i32, %c0_i32_0 : i32, i32
  }
  func.func @transform_6(%arg0: i32, %arg1: i32) -> (i32, i32) {
    %c0_i32 = arith.constant 0 : i32
    %c0_i32_0 = arith.constant 0 : i32
    %c0_i32_1 = arith.constant 0 : i32
    return %c0_i32, %c0_i32_0 : i32, i32
  }
  func.func @transform_7(%arg0: i32, %arg1: i32) -> (i32, i32) {
    %c0_i32 = arith.constant 0 : i32
    %c0_i32_0 = arith.constant 0 : i32
    return %arg0, %c0_i32 : i32, i32
  }
}

</mosaic_0001>

<bundles_post_ra>
// kernel: tpu_custom_call.1
= control target key start
LH: loop header
LB: loop body
LE: loop exit
PB: predicated region body
PF: predicated region fallthrough
CT: control target
= control target key end

     0   :  { %12 = vsyncpa [#allocation4], 0  ;;  %s1753_s0 = inlined_call_operand.vmem [shape: bf16[128,128], index: 0, kind: input, shape index: {}]   ;;  %s1754_s1 = inlined_call_operand.vmem [shape: bf16[128,128], index: 1, kind: input, shape index: {}]   ;;  %s1755_s2 = inlined_call_operand.hbm [shape: bf16[128,128], index: 2, kind: input, shape index: {}]   ;;  %s1756_s3 = inlined_call_operand.vmem [shape: f32[128,1], index: 3, kind: input, shape index: {}]   ;;  %s1757_s4 = inlined_call_operand.hbm [shape: bf16[128,128], index: 4, kind: input, shape index: {}]   ;;  %s1758_s5 = inlined_call_operand.hbm [shape: bf16[128,128], index: 5, kind: input, shape index: {}]   ;;  %s1759_s6 = inlined_call_operand.vmem [shape: f32[1,128], index: 6, kind: input, shape index: {}]   ;;  %s1760_s7 = inlined_call_operand.hbm [shape: bf16[128,128], index: 7, kind: output, shape index: {}]  }
   0x1   :  { %13 = vsyncpa [#allocation7], 0 }
   0x2   :  { %14 = vsyncpa [#allocation5], 0  ;;  %s1474_s24 = smov [#allocation6]   ;;  %s1475_s26 = smov [#allocation3]  }
   0x3   :  { %s38_s25 = sshll.u32 %s1474_s24, 4  ;;  %s24_s27 = sshll.u32 %s1475_s26, 4  ;;  %s39_s25 = int_to_ptr.vmem [resolvable:$true] %s38_s25  ;;  %s1521_s27 = int_to_ptr.vmem [resolvable:$true] %s24_s27 }
   0x4   :  { %s1380_s30 = scalar_lea.hbm %s1757_s4, 1024 }
   0x5   :  { %p1381_p0 = scmp.ne.s32.totalorder %s1757_s4, %s1380_s30  ;;  %p1384_p1 = scmp.lt.u32.totalorder %s1380_s30, %s1757_s4 }
   0x7   :  { %p1386_p2 = pnand %p1384_p1, %p1381_p0 }
   0x9   :  { %1389 = shalt.err (!%p1386_p2)
}
   0xa   :  { %s1390_s12 = scalar_lea.vmem %s39_s25, 1024  ;;  %p1395_p4 = scmp.lt.s32.totalorder %s39_s25, %s39_s25 }
   0xb   :  { %p1391_p3 = scmp.ne.s32.totalorder %s39_s25, %s1390_s12  ;;  %p1396_p5 = scmp.lt.s32.totalorder %s1390_s12, %s1390_s12 }
   0xd   :  { %p1397_p6 = por %p1396_p5, %p1395_p4 }
   0xf   :  { %p1398_p7 = pnand %p1397_p6, %p1391_p3 }
  0x11   :  { %1401 = shalt.err (!%p1398_p7)
}
  0x12   :  { %s1476_s13 = smov 64   ;;  %s1477_s14 = smov 4  }
  0x13   :  { %44 = dma.hbm_to_vmem [thread:$0]  %s1757_s4, 1024, %s39_s25, [#allocation7], %s1476_s13, %s1476_s13, %s1477_s14  }
  0x14   :  { %s1402_s19 = scalar_lea.hbm %s1755_s2, 1024 }
  0x15   :  { %p1403_p8 = scmp.ne.s32.totalorder %s1755_s2, %s1402_s19  ;;  %p1406_p9 = scmp.lt.u32.totalorder %s1402_s19, %s1755_s2 }
  0x17   :  { %p1408_p10 = pnand %p1406_p9, %p1403_p8 }
  0x19   :  { %1411 = shalt.err (!%p1408_p10)
}
  0x1a   :  { %s1412_s24 = scalar_lea.vmem %s1521_s27, 1024  ;;  %p1417_p12 = scmp.lt.s32.totalorder %s1521_s27, %s1521_s27 }
  0x1b   :  { %p1413_p11 = scmp.ne.s32.totalorder %s1521_s27, %s1412_s24  ;;  %p1418_p13 = scmp.lt.s32.totalorder %s1412_s24, %s1412_s24 }
  0x1d   :  { %p1419_p0 = por %p1418_p13, %p1417_p12 }
  0x1f   :  { %p1420_p1 = pnand %p1419_p0, %p1413_p11 }
  0x21   :  { %1423 = shalt.err (!%p1420_p1)
}
  0x22   :  { %30 = dma.hbm_to_vmem [thread:$0]  %s1755_s2, 1024, %s1521_s27, [#allocation4], %s1476_s13, %s1476_s13, %s1477_s14  }
  0x23   :  { %s1478_s26 = smov [#allocation8]   ;;  %s1424_s8 = scalar_lea.hbm %s1758_s5, 1024 }
  0x24   :  { %s50_s28 = sshll.u32 %s1478_s26, 4  ;;  %p1425_p2 = scmp.ne.s32.totalorder %s1758_s5, %s1424_s8  ;;  %s51_s28 = int_to_ptr.vmem [resolvable:$true] %s50_s28 }
  0x25   :  { %p1428_p3 = scmp.lt.u32.totalorder %s1424_s8, %s1758_s5 }
  0x27   :  { %p1430_p4 = pnand %p1428_p3, %p1425_p2 }
  0x29   :  { %1433 = shalt.err (!%p1430_p4)
}
  0x2a   :  { %s1434_s15 = scalar_lea.vmem %s51_s28, 1024  ;;  %p1439_p6 = scmp.lt.s32.totalorder %s51_s28, %s51_s28 }
  0x2b   :  { %p1435_p5 = scmp.ne.s32.totalorder %s51_s28, %s1434_s15  ;;  %p1440_p7 = scmp.lt.s32.totalorder %s1434_s15, %s1434_s15 }
  0x2d   :  { %p1441_p8 = por %p1440_p7, %p1439_p6 }
  0x2f   :  { %p1442_p9 = pnand %p1441_p8, %p1435_p5 }
  0x31   :  { %1445 = shalt.err (!%p1442_p9)
}
  0x32   :  { %56 = dma.hbm_to_vmem [thread:$0]  %s1758_s5, 1024, %s51_s28, [#allocation7], %s1476_s13, %s1476_s13, %s1477_s14  }
  0x33   :  { %1468 = dma.done.wait [#allocation4], 1024  }
  0x34   :  { %1469 = vsyncadd [#allocation4], 4294966272 }
  0x35   :  { %1470 = dma.done.wait [#allocation7], 2048  }
  0x36   :  { %1471 = vsyncadd [#allocation7], 4294965248  ;;  %v1479_v0 = vmov 0   ;;  %v1340_v1 = vld [vmem:[%s1754_s1] sm:$0xff]   ;;  %v1341_v2 = vld [vmem:[%s1754_s1 + $0x8] sm:$0xff]  }
  0x37   :  { %1338 = vset.pattern.permute.xlu0 %v1479_v0  ;;  %1339 = vset.pattern.permute.xlu1 %v1479_v0  ;;  %v1342_v3 = vld [vmem:[%s1754_s1 + $0x10] sm:$0xff]   ;;  %v1343_v4 = vld [vmem:[%s1754_s1 + $0x18] sm:$0xff]   ;;  %v1348_v5 = vld [vmem:[%s1753_s0] sm:$0xff]  }
  0x38   :  { %1203 = vmatprep.subr.bf16.mxu0 %v1340_v1  ;;  %1219 = vmatprep.mubr.bf16.mxu0 %v1348_v5  ;;  %v1344_v6 = vld [vmem:[%s1754_s1 + $0x20] sm:$0xff]   ;;  %v1345_v7 = vld [vmem:[%s1754_s1 + $0x28] sm:$0xff]   ;;  %v392_v9 = vld [vmem:[%s1756_s3 + $0x10] sm:$0xff] }
  0x39   :  { %1204 = vmatpush3.bf16.msra.mxu0 %v1340_v1  ;;  %v390_v8 = vld [vmem:[%s1756_s3] sm:$0xff]  ;;  %418 = vperm.xlu1 %1339, %v392_v9   ;;  %v391_v10 = vld [vmem:[%s1756_s3 + $0x8] sm:$0xff]  ;;  %v393_v11 = vld [vmem:[%s1756_s3 + $0x18] sm:$0xff] }
  0x3a   :  { %1205 = vmatprep.subr.bf16.mxu0 %v1341_v2  ;;  %408 = vperm.xlu0 %1338, %v390_v8   ;;  %v1346_v12 = vld [vmem:[%s1754_s1 + $0x30] sm:$0xff]   ;;  %v394_v13 = vld [vmem:[%s1756_s3 + $0x20] sm:$0xff]  ;;  %v395_v14 = vld [vmem:[%s1756_s3 + $0x28] sm:$0xff] }
  0x3b   :  { %v1356_v15 = vld [vmem:[#allocation8] sm:$0xff]   ;;  %v1347_v16 = vld [vmem:[%s1754_s1 + $0x38] sm:$0xff]   ;;  %v396_v17 = vld [vmem:[%s1756_s3 + $0x30] sm:$0xff] }
  0x3c   :  { %1235 = vmatprep.subr.bf16.mxu1 %v1356_v15  ;;  %v1358_v18 = vld [vmem:[#allocation8 + $0x8] sm:$0xff]   ;;  %v397_v19 = vld [vmem:[%s1756_s3 + $0x38] sm:$0xff]  ;;  %v398_v21 = vld [vmem:[%s1756_s3 + $0x40] sm:$0xff] }
  0x3d   :  { %1206 = vmatpush3.bf16.msra.mxu0 %v1341_v2  ;;  %423 = vperm.xlu1 %1339, %v393_v11   ;;  %v1349_v20 = vld [vmem:[%s1753_s0 + $0x8] sm:$0xff]   ;;  %v1633_v23 = vld [vmem:[#allocation6] sm:$0xff]   ;;  %v1360_v24 = vld [vmem:[#allocation8 + $0x10] sm:$0xff]  }
  0x3e   :  { %1207 = vmatprep.subr.bf16.mxu0 %v1342_v3  ;;  %413 = vperm.xlu0 %1338, %v391_v10   ;;  %v399_v22 = vld [vmem:[%s1756_s3 + $0x48] sm:$0xff]  ;;  %v1350_v25 = vld [vmem:[%s1753_s0 + $0x10] sm:$0xff]   ;;  %v401_v27 = vld [vmem:[%s1756_s3 + $0x58] sm:$0xff] }
  0x3f   :  { %1236 = vmatpush3.bf16.msra.mxu1 %v1356_v15  ;;  %v400_v26 = vld [vmem:[%s1756_s3 + $0x50] sm:$0xff]  ;;  %v1645_v28 = vld [vmem:[#allocation6 + $0x8] sm:$0xff]   ;;  %v1362_v29 = vld [vmem:[#allocation8 + $0x18] sm:$0xff]  }
  0x40   :  { %1237 = vmatprep.subr.bf16.mxu1 %v1358_v18  ;;  %v1351_v30 = vld [vmem:[%s1753_s0 + $0x18] sm:$0xff]   ;;  %v402_v31 = vld [vmem:[%s1756_s3 + $0x60] sm:$0xff]  ;;  %v403_v32 = vld [vmem:[%s1756_s3 + $0x68] sm:$0xff] }
  0x41   :  { %1208 = vmatpush3.bf16.msra.mxu0 %v1342_v3  ;;  %433 = vperm.xlu1 %1339, %v395_v14   ;;  %v1658_v33 = vld [vmem:[#allocation6 + $0x10] sm:$0xff]   ;;  %v1364_v34 = vld [vmem:[#allocation8 + $0x20] sm:$0xff]   ;;  %v1665_v36 = vld [vmem:[#allocation6 + $0x18] sm:$0xff]  }
  0x42   :  { %1209 = vmatprep.subr.bf16.mxu0 %v1343_v4  ;;  %428 = vperm.xlu0 %1338, %v394_v13   ;;  %v1352_v35 = vld [vmem:[%s1753_s0 + $0x20] sm:$0xff]   ;;  %v1366_v37 = vld [vmem:[#allocation8 + $0x28] sm:$0xff]   ;;  %v404_v38 = vld [vmem:[%s1756_s3 + $0x70] sm:$0xff] }
  0x43   :  { %1238 = vmatpush3.bf16.msra.mxu1 %v1358_v18  ;;  %v405_v39 = vld [vmem:[%s1756_s3 + $0x78] sm:$0xff]  ;;  %v1675_v40 = vld [vmem:[#allocation6 + $0x20] sm:$0xff]   ;;  %v1368_v41 = vld [vmem:[#allocation8 + $0x30] sm:$0xff]  }
  0x44   :  { %1239 = vmatprep.subr.bf16.mxu1 %v1360_v24  ;;  %v1353_v42 = vld [vmem:[%s1753_s0 + $0x28] sm:$0xff]   ;;  %v1354_v43 = vld [vmem:[%s1753_s0 + $0x30] sm:$0xff]   ;;  %v1355_v45 = vld [vmem:[%s1753_s0 + $0x38] sm:$0xff]  }
  0x45   :  { %1210 = vmatpush3.bf16.msra.mxu0 %v1343_v4  ;;  %443 = vperm.xlu1 %1339, %v397_v19   ;;  %v1685_v44 = vld [vmem:[#allocation6 + $0x28] sm:$0xff]   ;;  %v1693_v46 = vld [vmem:[#allocation6 + $0x30] sm:$0xff]   ;;  %v1370_v47 = vld [vmem:[#allocation8 + $0x38] sm:$0xff]  }
  0x46   :  { %1211 = vmatprep.subr.bf16.mxu0 %v1344_v6  ;;  %438 = vperm.xlu0 %1338, %v396_v17   ;;  %v1697_v48 = vld [vmem:[#allocation6 + $0x38] sm:$0xff]   ;;  %v1372_v49 = vld [vmem:[#allocation3] sm:$0xff]   ;;  %v1373_v50 = vld [vmem:[#allocation3 + $0x8] sm:$0xff]  }
  0x47   :  { %1240 = vmatpush3.bf16.msra.mxu1 %v1360_v24  ;;  %v1374_v51 = vld [vmem:[#allocation3 + $0x10] sm:$0xff]   ;;  %v1375_v52 = vld [vmem:[#allocation3 + $0x18] sm:$0xff]  }
  0x48   :  { %1241 = vmatprep.subr.bf16.mxu1 %v1362_v29 }
  0x49   :  { %1212 = vmatpush3.bf16.msra.mxu0 %v1344_v6  ;;  %453 = vperm.xlu1 %1339, %v399_v22  }
  0x4a   :  { %1213 = vmatprep.subr.bf16.mxu0 %v1345_v7  ;;  %448 = vperm.xlu0 %1338, %v398_v21  }
  0x4b   :  { %1242 = vmatpush3.bf16.msra.mxu1 %v1362_v29 }
  0x4c   :  { %1243 = vmatprep.subr.bf16.mxu1 %v1364_v34 }
  0x4d   :  { %1214 = vmatpush3.bf16.msra.mxu0 %v1345_v7  ;;  %463 = vperm.xlu1 %1339, %v401_v27  }
  0x4e   :  { %1215 = vmatprep.subr.bf16.mxu0 %v1346_v12  ;;  %458 = vperm.xlu0 %1338, %v400_v26  }
  0x4f   :  { %1244 = vmatpush3.bf16.msra.mxu1 %v1364_v34 }
  0x50   :  { %1245 = vmatprep.subr.bf16.mxu1 %v1366_v37 }
  0x51   :  { %1216 = vmatpush3.bf16.msra.mxu0 %v1346_v12  ;;  %473 = vperm.xlu1 %1339, %v403_v32  }
  0x52   :  { %1217 = vmatprep.subr.bf16.mxu0 %v1347_v16  ;;  %468 = vperm.xlu0 %1338, %v402_v31  }
  0x53   :  { %1246 = vmatpush3.bf16.msra.mxu1 %v1366_v37 }
  0x54   :  { %1247 = vmatprep.subr.bf16.mxu1 %v1368_v41 }
  0x55   :  { %1218 = vmatpush3.bf16.msra.mxu0 %v1347_v16  ;;  %483 = vperm.xlu1 %1339, %v405_v39  }
  0x56   :  { %1267 = vmatprep.subr.bf16.mxu0 %v1633_v23  ;;  %478 = vperm.xlu0 %1338, %v404_v38  }
  0x57   :  { %1248 = vmatpush3.bf16.msra.mxu1 %v1368_v41 }
  0x58   :  { %1220 = vmatmul.mubr.bf16.vlgmr.msra.gmra.mrb[0].mxu0 %v1349_v20  ;;  %1249 = vmatprep.subr.bf16.mxu1 %v1370_v47 }
  0x59   :  { %1223 = vmatprep.mubr.bf16.mxu0 %v1350_v25  ;;  %1268 = vmatpush3.bf16.msra.mxu0 %v1633_v23 }
  0x5a   :  { %1269 = vmatprep.subr.bf16.mxu0 %v1645_v28 }
  0x5b   :  { %1250 = vmatpush3.bf16.msra.mxu1 %v1370_v47 }
  0x5c   :  { %1299 = vmatprep.subr.bf16.mxu1 %v1633_v23 }
  0x5d   :  { %1270 = vmatpush3.bf16.msra.mxu0 %v1645_v28 }
  0x5e   :  { %1271 = vmatprep.subr.bf16.mxu0 %v1658_v33 }
  0x60   :  { %1224 = vmatmul.mubr.bf16.gmra.mrb[4].mxu0 %v1351_v30 }
  0x61   :  { %1227 = vmatprep.mubr.bf16.mxu0 %v1352_v35  ;;  %1272 = vmatpush3.bf16.msra.mxu0 %v1658_v33 }
  0x62   :  { %1273 = vmatprep.subr.bf16.mxu0 %v1665_v36 }
  0x65   :  { %1274 = vmatpush3.bf16.msra.mxu0 %v1665_v36 }
  0x66   :  { %1275 = vmatprep.subr.bf16.mxu0 %v1675_v40 }
  0x68   :  { %1228 = vmatmul.mubr.bf16.gmra.mrb[8].mxu0 %v1353_v42 }
  0x69   :  { %1231 = vmatprep.mubr.bf16.mxu0 %v1354_v43  ;;  %1276 = vmatpush3.bf16.msra.mxu0 %v1675_v40 }
  0x6a   :  { %1277 = vmatprep.subr.bf16.mxu0 %v1685_v44 }
  0x6d   :  { %1278 = vmatpush3.bf16.msra.mxu0 %v1685_v44 }
  0x6e   :  { %1279 = vmatprep.subr.bf16.mxu0 %v1693_v46 }
  0x70   :  { %1232 = vmatmul.mubr.bf16.gmra.mrb[12].mxu0 %v1355_v45 }
  0x71   :  { %1280 = vmatpush3.bf16.msra.mxu0 %v1693_v46  ;;  %1283 = vmatprep.mubr.bf16.mxu0 %v1372_v49  ;;  %v1376_v49 = vld [vmem:[#allocation3 + $0x20] sm:$0xff]  }
  0x72   :  { %1281 = vmatprep.subr.bf16.mxu0 %v1697_v48 }
  0x75   :  { %1282 = vmatpush3.bf16.msra.mxu0 %v1697_v48 }
  0x78   :  { %1284 = vmatmul.mubr.bf16.vlgmr.msra.gmra.mrb[16].mxu0 %v1373_v50  ;;  %v1378_v50 = vld [vmem:[#allocation3 + $0x30] sm:$0xff]  }
  0x79   :  { %1287 = vmatprep.mubr.bf16.mxu0 %v1374_v51  ;;  %v1379_v51 = vld [vmem:[#allocation3 + $0x38] sm:$0xff]  }
  0x80   :  { %1288 = vmatmul.mubr.bf16.gmra.mrb[20].mxu0 %v1375_v52 }
  0xb8   :  { %v419_v54 = vpop.permute.xlu1 %418 }
  0xb9   :  { %v409_v53 = vpop.permute.xlu0 %408 }
  0xbc   :  { %v424_v56 = vpop.permute.xlu1 %423 }
  0xbd   :  { %v414_v55 = vpop.permute.xlu0 %413 }
  0xc0   :  { %v434_v58 = vpop.permute.xlu1 %433 }
  0xc1   :  { %v429_v57 = vpop.permute.xlu0 %428 }
  0xc4   :  { %v444_v62 = vpop.permute.xlu1 %443 }
  0xc5   :  { %v439_v60 = vpop.permute.xlu0 %438 }
  0xc8   :  { %v454_v8 = vpop.permute.xlu1 %453 }
  0xc9   :  { %v449_v7 = vpop.permute.xlu0 %448 }
  0xcc   :  { %v464_v19 = vpop.permute.xlu1 %463 }
  0xcd   :  { %v459_v17 = vpop.permute.xlu0 %458 }
  0xd0   :  { %v474_v29 = vpop.permute.xlu1 %473 }
  0xd1   :  { %v469_v24 = vpop.permute.xlu0 %468 }
  0xd4   :  { %v484_v37 = vpop.permute.xlu1 %483 }
  0xd5   :  { %v479_v35 = vpop.permute.xlu0 %478 }
 0x12b   :  { %v1221_v59 = vpop.f32.mrb[0].mxu0 }
 0x12c   :  { %v236_v61 = vpop.f32.mrb[1].mxu0  ;;  %v488_v0 = vmul.f32 %v1221_v59, %v419_v54  ;;  %v1720_v59 = vld [vmem:[%s1759_s6] ss:$0 sm:$0xff]  ;;  %s1480_s6 = smov [#allocation9]  }
 0x12d   :  { %v1222_v63 = vpop.f32.mrb[2].mxu0  ;;  %v486_v3 = vmul.f32 %v409_v53, %v236_v61  ;;  %s1020_s29 = sshll.u32 %s1480_s6, 4  ;;  %s1021_s29 = int_to_ptr.vmem [resolvable:$true] %s1020_s29 }
 0x12e   :  { %v489_v1 = vmul.f32 %v1222_v63, %v424_v56  ;;  %v239_v2 = vpop.f32.mrb[3].mxu0  ;;  %s1446_s30 = scalar_lea.vmem %s1021_s29, 1024  ;;  %p1451_p11 = scmp.lt.s32.totalorder %s1021_s29, %s1021_s29 }
 0x12f   :  { %v487_v4 = vmul.f32 %v414_v55, %v239_v2  ;;  %p1447_p10 = scmp.ne.s32.totalorder %s1021_s29, %s1446_s30  ;;  %p1452_p12 = scmp.lt.s32.totalorder %s1446_s30, %s1446_s30 }
 0x130   :  { %v535_v5 = vpack.c.bf16 %v489_v1, %v488_v0 }
 0x131   :  { %v534_v6 = vpack.c.bf16 %v487_v4, %v486_v3  ;;  %p1453_p13 = por %p1452_p12, %p1451_p11 }
 0x133   :  { %v1225_v9 = vpop.f32.mrb[4].mxu0  ;;  %1251 = vmatprep.mubr.bf16.mxu1 %v534_v6  ;;  %p1454_p0 = pnand %p1453_p13, %p1447_p10 }
 0x134   :  { %v252_v10 = vpop.f32.mrb[5].mxu0  ;;  %1252 = vmatmul.mubr.bf16.vlgmr.msra.gmra.mrb[0].mxu1 %v535_v5  ;;  %v492_v12 = vmul.f32 %v1225_v9, %v439_v60 }
 0x135   :  { %1307 = vmatpush3.bf16.msra.mxu1 %v1633_v23  ;;  %v1226_v11 = vpop.f32.mrb[6].mxu0  ;;  %v490_v15 = vmul.f32 %v429_v57, %v252_v10 }
 0x136   :  { %v493_v13 = vmul.f32 %v1226_v11, %v444_v62  ;;  %v255_v14 = vpop.f32.mrb[7].mxu0  ;;  %1300 = vmatprep.subr.bf16.mxu1 %v1645_v28 }
 0x137   :  { %v491_v16 = vmul.f32 %v434_v58, %v255_v14 }
 0x138   :  { %v537_v18 = vpack.c.bf16 %v493_v13, %v492_v12 }
 0x139   :  { %v536_v20 = vpack.c.bf16 %v491_v16, %v490_v15  ;;  %1308 = vmatpush3.bf16.msra.mxu1 %v1645_v28 }
 0x13a   :  { %1301 = vmatprep.subr.bf16.mxu1 %v1658_v33 }
 0x13b   :  { %v1229_v21 = vpop.f32.mrb[8].mxu0  ;;  %1255 = vmatprep.mubr.bf16.mxu1 %v536_v20 }
 0x13c   :  { %v268_v22 = vpop.f32.mrb[9].mxu0  ;;  %1256 = vmatmul.mubr.bf16.gmra.mrb[4].mxu1 %v537_v18  ;;  %v496_v25 = vmul.f32 %v1229_v21, %v459_v17 }
 0x13d   :  { %1309 = vmatpush3.bf16.msra.mxu1 %v1658_v33  ;;  %v1230_v23 = vpop.f32.mrb[10].mxu0  ;;  %v494_v30 = vmul.f32 %v449_v7, %v268_v22 }
 0x13e   :  { %v497_v26 = vmul.f32 %v1230_v23, %v464_v19  ;;  %v271_v27 = vpop.f32.mrb[11].mxu0  ;;  %1302 = vmatprep.subr.bf16.mxu1 %v1665_v36 }
 0x13f   :  { %v495_v31 = vmul.f32 %v454_v8, %v271_v27 }
 0x140   :  { %v539_v32 = vpack.c.bf16 %v497_v26, %v496_v25 }
 0x141   :  { %v538_v28 = vpack.c.bf16 %v495_v31, %v494_v30  ;;  %1310 = vmatpush3.bf16.msra.mxu1 %v1665_v36 }
 0x142   :  { %1303 = vmatprep.subr.bf16.mxu1 %v1675_v40 }
 0x143   :  { %v1233_v34 = vpop.f32.mrb[12].mxu0  ;;  %1259 = vmatprep.mubr.bf16.mxu1 %v538_v28 }
 0x144   :  { %v284_v33 = vpop.f32.mrb[13].mxu0  ;;  %1260 = vmatmul.mubr.bf16.gmra.mrb[8].mxu1 %v539_v32  ;;  %v500_v39 = vmul.f32 %v1233_v34, %v479_v35 }
 0x145   :  { %1311 = vmatpush3.bf16.msra.mxu1 %v1675_v40  ;;  %v1234_v38 = vpop.f32.mrb[14].mxu0  ;;  %v498_v43 = vmul.f32 %v469_v24, %v284_v33  ;;  %v1377_v40 = vld [vmem:[#allocation3 + $0x28] sm:$0xff]  }
 0x146   :  { %v501_v41 = vmul.f32 %v1234_v38, %v484_v37  ;;  %v287_v42 = vpop.f32.mrb[15].mxu0  ;;  %1304 = vmatprep.subr.bf16.mxu1 %v1685_v44 }
 0x147   :  { %v499_v45 = vmul.f32 %v474_v29, %v287_v42 }
 0x148   :  { %v541_v47 = vpack.c.bf16 %v501_v41, %v500_v39 }
 0x149   :  { %v540_v36 = vpack.c.bf16 %v499_v45, %v498_v43  ;;  %1312 = vmatpush3.bf16.msra.mxu1 %v1685_v44 }
 0x14a   :  { %1305 = vmatprep.subr.bf16.mxu1 %v1693_v46 }
 0x14b   :  { %1263 = vmatprep.mubr.bf16.mxu1 %v540_v36  ;;  %v1285_v52 = vpop.f32.mrb[16].mxu0 }
 0x14c   :  { %1264 = vmatmul.mubr.bf16.gmra.mrb[12].mxu1 %v541_v47  ;;  %v833_v44 = vpop.f32.mrb[17].mxu0 }
 0x14d   :  { %1313 = vmatpush3.bf16.msra.mxu1 %v1693_v46  ;;  %1291 = vmatprep.mubr.bf16.mxu1 %v1376_v49  ;;  %v1286_v53 = vpop.f32.mrb[18].mxu0 }
 0x14e   :  { %1306 = vmatprep.subr.bf16.mxu1 %v1697_v48  ;;  %v836_v54 = vpop.f32.mrb[19].mxu0 }
 0x151   :  { %1314 = vmatpush3.bf16.msra.mxu1 %v1697_v48 }
 0x153   :  { %v1289_v55 = vpop.f32.mrb[20].mxu0 }
 0x154   :  { %1292 = vmatmul.mubr.bf16.vlgmr.msra.gmra.mrb[8].mxu1 %v1377_v40  ;;  %v849_v56 = vpop.f32.mrb[21].mxu0 }
 0x155   :  { %1295 = vmatprep.mubr.bf16.mxu1 %v1378_v50  ;;  %v1290_v57 = vpop.f32.mrb[22].mxu0 }
 0x156   :  { %v852_v58 = vpop.f32.mrb[23].mxu0 }
 0x15c   :  { %1296 = vmatmul.mubr.bf16.gmra.mrb[12].mxu1 %v1379_v51 }
 0x207   :  { %v1253_v46 = vpop.f32.mrb[0].mxu1 }
 0x208   :  { %v842_v48 = vadd.f32 %v1285_v52, %v1253_v46  ;;  %v640_v60 = vpop.f32.mrb[1].mxu1 }
 0x209   :  { %v834_v61 = vadd.f32 %v833_v44, %v640_v60  ;;  %v1254_v62 = vpop.f32.mrb[2].mxu1 }
 0x20a   :  { %v905_v63 = vadd.f32 %v1720_v59, %v842_v48  ;;  %v845_v0 = vadd.f32 %v1286_v53, %v1254_v62  ;;  %v643_v1 = vpop.f32.mrb[3].mxu1 }
 0x20b   :  { %v903_v2 = vadd.f32 %v1720_v59, %v834_v61  ;;  %v837_v3 = vadd.f32 %v836_v54, %v643_v1 }
 0x20c   :  { %v906_v4 = vadd.f32 %v1720_v59, %v845_v0  ;;  %v921_v6 = vmax.f32 %v905_v63, 0.0 }
 0x20d   :  { %v904_v5 = vadd.f32 %v1720_v59, %v837_v3  ;;  %v919_v8 = vmax.f32 %v903_v2, 0.0 }
 0x20e   :  { %v922_v7 = vmax.f32 %v906_v4, 0.0 }
 0x20f   :  { %v920_v9 = vmax.f32 %v904_v5, 0.0  ;;  %v1257_v10 = vpop.f32.mrb[4].mxu1 }
 0x210   :  { %v1116_v11 = vpack.c.bf16 %v922_v7, %v921_v6  ;;  %v858_v12 = vadd.f32 %v1289_v55, %v1257_v10  ;;  %v656_v13 = vpop.f32.mrb[5].mxu1 }
 0x211   :  { %v1111_v14 = vpack.c.bf16 %v920_v9, %v919_v8  ;;  %v850_v15 = vadd.f32 %v849_v56, %v656_v13  ;;  %v1258_v16 = vpop.f32.mrb[6].mxu1 }
 0x212   :  { %1148 = vst [vmem:[#allocation9 + $0x8] sm:$0xff] %v1116_v11   ;;  %v909_v17 = vadd.f32 %v1720_v59, %v858_v12  ;;  %v861_v18 = vadd.f32 %v1290_v57, %v1258_v16  ;;  %v659_v19 = vpop.f32.mrb[7].mxu1 }
 0x213   :  { %1112 = vst [vmem:[#allocation9] sm:$0xff] %v1111_v14   ;;  %v907_v20 = vadd.f32 %v1720_v59, %v850_v15  ;;  %v853_v21 = vadd.f32 %v852_v58, %v659_v19 }
 0x214   :  { %v910_v22 = vadd.f32 %v1720_v59, %v861_v18  ;;  %v925_v24 = vmax.f32 %v909_v17, 0.0 }
 0x215   :  { %v908_v23 = vadd.f32 %v1720_v59, %v853_v21  ;;  %v923_v26 = vmax.f32 %v907_v20, 0.0 }
 0x216   :  { %v926_v25 = vmax.f32 %v910_v22, 0.0 }
 0x217   :  { %v924_v27 = vmax.f32 %v908_v23, 0.0 }
 0x218   :  { %v1126_v29 = vpack.c.bf16 %v926_v25, %v925_v24 }
 0x219   :  { %v1121_v30 = vpack.c.bf16 %v924_v27, %v923_v26 }
 0x21a   :  { %1150 = vst [vmem:[#allocation9 + $0x18] sm:$0xff] %v1126_v29  }
 0x21b   :  { %1149 = vst [vmem:[#allocation9 + $0x10] sm:$0xff] %v1121_v30  }
 0x227   :  { %v1293_v31 = vpop.f32.mrb[8].mxu1 }
 0x228   :  { %v913_v32 = vadd.f32 %v1293_v31, %v1720_v59  ;;  %v865_v28 = vpop.f32.mrb[9].mxu1 }
 0x229   :  { %v911_v34 = vadd.f32 %v1720_v59, %v865_v28  ;;  %v1294_v35 = vpop.f32.mrb[10].mxu1 }
 0x22a   :  { %v914_v33 = vadd.f32 %v1294_v35, %v1720_v59  ;;  %v868_v37 = vpop.f32.mrb[11].mxu1  ;;  %v929_v39 = vmax.f32 %v913_v32, 0.0 }
 0x22b   :  { %v912_v38 = vadd.f32 %v1720_v59, %v868_v37  ;;  %v927_v42 = vmax.f32 %v911_v34, 0.0 }
 0x22c   :  { %v930_v41 = vmax.f32 %v914_v33, 0.0 }
 0x22d   :  { %v928_v43 = vmax.f32 %v912_v38, 0.0 }
 0x22e   :  { %v1136_v45 = vpack.c.bf16 %v930_v41, %v929_v39 }
 0x22f   :  { %v1131_v47 = vpack.c.bf16 %v928_v43, %v927_v42  ;;  %v1297_v36 = vpop.f32.mrb[12].mxu1 }
 0x230   :  { %1152 = vst [vmem:[#allocation9 + $0x28] sm:$0xff] %v1136_v45   ;;  %v917_v49 = vadd.f32 %v1297_v36, %v1720_v59  ;;  %v881_v40 = vpop.f32.mrb[13].mxu1 }
 0x231   :  { %1151 = vst [vmem:[#allocation9 + $0x20] sm:$0xff] %v1131_v47   ;;  %v915_v50 = vadd.f32 %v1720_v59, %v881_v40  ;;  %v1298_v51 = vpop.f32.mrb[14].mxu1 }
 0x232   :  { %v918_v52 = vadd.f32 %v1298_v51, %v1720_v59  ;;  %v884_v44 = vpop.f32.mrb[15].mxu1  ;;  %v933_v54 = vmax.f32 %v917_v49, 0.0 }
 0x233   :  { %v916_v53 = vadd.f32 %v1720_v59, %v884_v44  ;;  %v931_v56 = vmax.f32 %v915_v50, 0.0 }
 0x234   :  { %v934_v55 = vmax.f32 %v918_v52, 0.0 }
 0x235   :  { %v932_v57 = vmax.f32 %v916_v53, 0.0 }
 0x236   :  { %v1146_v58 = vpack.c.bf16 %v934_v55, %v933_v54 }
 0x237   :  { %v1141_v46 = vpack.c.bf16 %v932_v57, %v931_v56 }
 0x238   :  { %1154 = vst [vmem:[#allocation9 + $0x38] sm:$0xff] %v1146_v58  }
 0x239   :  { %1153 = vst [vmem:[#allocation9 + $0x30] sm:$0xff] %v1141_v46  }
 0x23a   :  { %1457 = shalt.err (!%p1454_p0)
}
 0x23b   :  { %s1458_s10 = scalar_lea.hbm %s1760_s7, 1024 }
 0x23c   :  { %p1459_p1 = scmp.ne.s32.totalorder %s1760_s7, %s1458_s10  ;;  %p1462_p2 = scmp.lt.u32.totalorder %s1458_s10, %s1760_s7 }
 0x23e   :  { %p1464_p3 = pnand %p1462_p2, %p1459_p1 }
 0x240   :  { %1467 = shalt.err (!%p1464_p3)
}
 0x241   :  { %1026 = dma.vmem_to_hbm [thread:$0]  %s1021_s29, 1024, %s1760_s7, [#allocation5], %s1476_s13, %s1476_s13, %s1477_s14  }
 0x242   :  { %1472 = dma.done.wait [#allocation5], 1024  }
 0x243   :  { %1473 = vsyncadd [#allocation5], 4294966272 }
 0x244   :  { %1030 = vsyncpa [#allocation4], 1 }
 0x245   :  { %1031 = vsyncpa [#allocation7], 1 }
 0x246   :  { %1032 = vsyncpa [#allocation5], 1 }

</bundles_post_ra>
